<compile_context>
chip_gen: v7x
topology: tpu7x:2x2x1
jax: 0.10.0
libtpu: 0.0.40
codegen_flags: <defaults>
</compile_context>

<pallas_src>
from functools import partial

import jax
import jax.numpy as jnp
from jax.experimental import pallas as pl
from jax.experimental.pallas import tpu as pltpu


def _round_up(n, m):
    return ((n + m - 1) // m) * m


def _cdiv(a, b):
    return (a + b - 1) // b


def qvalue_kernel(x_ref, a_ref, w1x_ref, w1a_ref, b1_ref, w2_ref, b2_ref, o_ref):
    """relu(x@W1x + a@W1a + b1), then contract against the w2 row -> (1, TB)."""
    # Layer 1 on the MXU; the torch `cat` is fused as two partial matmuls.
    h = jnp.dot(x_ref[...], w1x_ref[...], preferred_element_type=jnp.float32)
    h = h + jnp.dot(a_ref[...], w1a_ref[...], preferred_element_type=jnp.float32)
    h = jnp.maximum(h + b1_ref[...], 0.0)                       # (TB, Hp)

    # Layer 2: out_features == 1, so contract h against the single w2 row and
    # emit the Q-values lane-dense as a (1, TB) row.
    q = jax.lax.dot_general(
        w2_ref[...], h,
        dimension_numbers=(((1,), (1,)), ((), ())),
        preferred_element_type=jnp.float32)                     # (1, TB)
    o_ref[...] = (q + b2_ref[0, 0]).astype(o_ref.dtype)


def prepare_params(params, state_dim):
    """One-time weight prep (hoisted off the hot path).

    Splits W1 at the concat boundary and zero-pads the hidden axis to a
    multiple of 128 (zero columns -> relu(0)=0 -> zero contribution through
    the zero w2 column: exact).
    """
    w1, b1, w2, b2 = params
    hidden = w1.shape[1]
    Hp = _round_up(hidden, 128)
    pad_h = ((0, 0), (0, Hp - hidden))
    w1x = jnp.pad(w1[:state_dim], pad_h)    # (state_dim, Hp)
    w1a = jnp.pad(w1[state_dim:], pad_h)    # (action_dim, Hp)
    b1p = jnp.pad(b1, pad_h)                # (1, Hp)
    w2r = jnp.pad(w2.T, pad_h)              # (1, Hp)
    b2s = b2.reshape(1, 1)
    return w1x, w1a, b1p, w2r, b2s


def _pick_tile(B, block_b):
    """Batch tile: multiple of 128, large to amortize step overhead, but small
    enough that B > 128 gives >= 2 grid steps (v7x megacore)."""
    tb = _round_up(max(1, min(block_b, B)), 128)
    if B > 128:
        tb = min(tb, _round_up(_cdiv(B, 2), 128))
    return max(tb, 128)


@partial(jax.jit, static_argnames=("block_b",))
def qvalue_forward(x, a, prepped, *, block_b=4096):
    """x: (B, state_dim), a: (B, action_dim) -> (B, 1) Q-values."""
    w1x, w1a, b1p, w2r, b2s = prepped
    B, state_dim = x.shape
    action_dim = a.shape[1]
    Hp = w1x.shape[1]

    TB = _pick_tile(B, block_b)
    grid = (_cdiv(B, TB),)

    # VMEM budget: double-buffered x/a tiles + resident weights + output rows
    # + layer-1 activation temporaries, clamped to v7x's 64 MiB per-TC VMEM.
    vmem_bytes = (
        2 * TB * (state_dim + action_dim) * 4   # x/a tiles (double-buffered)
        + (state_dim + action_dim) * Hp * 4     # resident W1
        + 2 * Hp * 4                            # b1, w2 row
        + 2 * TB * 4                            # (1, TB) output (double-buffered)
        + TB * Hp * 4                           # h intermediate
    )
    vmem_limit = int(min(64 * 1024 * 1024,
                         max(32 * 1024 * 1024, int(vmem_bytes * 1.5))))

    out_row = pl.pallas_call(
        qvalue_kernel,
        out_shape=jax.ShapeDtypeStruct((1, B), jnp.float32),
        grid=grid,
        in_specs=[
            pl.BlockSpec((TB, state_dim), lambda i: (i, 0)),         # x tile (pipelined)
            pl.BlockSpec((TB, action_dim), lambda i: (i, 0)),        # a tile (pipelined)
            pl.BlockSpec((state_dim, Hp), lambda i: (0, 0)),         # W1[:S]  resident
            pl.BlockSpec((action_dim, Hp), lambda i: (0, 0)),        # W1[S:]  resident
            pl.BlockSpec((1, Hp), lambda i: (0, 0)),                 # b1      resident
            pl.BlockSpec((1, Hp), lambda i: (0, 0)),                 # w2 row  resident
            pl.BlockSpec((1, 1), lambda i: (0, 0),
                         memory_space=pltpu.MemorySpace.SMEM),       # b2 scalar
        ],
        out_specs=pl.BlockSpec((1, TB), lambda i: (0, i)),           # lane-dense output
        compiler_params=pltpu.CompilerParams(
            dimension_semantics=("parallel",),                       # megacore split (v7x)
            vmem_limit_bytes=vmem_limit),
    )(x, a, w1x, w1a, b1p, w2r, b2s)

    return out_row[0, :].reshape(B, 1)


def init_params(key, state_dim, hidden_dim, action_dim):
    """Deterministic init mimicking torch.nn.Linear (U(-1/sqrt(fan_in), +...))."""
    d_in = state_dim + action_dim
    k1, k2, k3, k4 = jax.random.split(key, 4)
    bound1 = 1.0 / jnp.sqrt(d_in)
    bound2 = 1.0 / jnp.sqrt(hidden_dim)
    # Stored as (in, out) so kernels compute x @ W (equivalent to x @ W_torch^T).
    w1 = jax.random.uniform(k1, (d_in, hidden_dim), jnp.float32, -bound1, bound1)
    b1 = jax.random.uniform(k2, (1, hidden_dim), jnp.float32, -bound1, bound1)
    w2 = jax.random.uniform(k3, (hidden_dim, 1), jnp.float32, -bound2, bound2)
    b2 = jax.random.uniform(k4, (1, 1), jnp.float32, -bound2, bound2)
    return w1, b1, w2, b2


def reference_forward(x, a, params):
    """Pure-JAX reference matching the PyTorch module semantics."""
    w1, b1, w2, b2 = params
    cat = jnp.concatenate([x, a], axis=1)
    h = jnp.maximum(cat @ w1 + b1, 0.0)
    return h @ w2 + b2


if __name__ == "__main__":
    batch, state_dim, hidden_dim, action_dim = 2, 16, 32, 8

    key = jax.random.PRNGKey(0)
    kx, ka, kp = jax.random.split(key, 3)
    x = jax.random.normal(kx, (batch, state_dim), jnp.float32)
    a = jax.random.normal(ka, (batch, action_dim), jnp.float32)
    params = init_params(kp, state_dim, hidden_dim, action_dim)

    # One-time weight prep (off the hot path); forward itself is jitted.
    prepped = jax.block_until_ready(prepare_params(params, state_dim))

    out = jax.block_until_ready(qvalue_forward(x, a, prepped))
    ref = reference_forward(x, a, params)
    assert out.shape == (batch, 1)
    assert jnp.allclose(out, ref, atol=1e-5, rtol=1e-5)

    # Larger, non-aligned batch: exercises the multi-tile grid + masked edge block.
    big_b = 700
    kx2, ka2 = jax.random.split(jax.random.PRNGKey(1))
    xb = jax.random.normal(kx2, (big_b, state_dim), jnp.float32)
    ab = jax.random.normal(ka2, (big_b, action_dim), jnp.float32)
    out_b = jax.block_until_ready(qvalue_forward(xb, ab, prepped))
    ref_b = reference_forward(xb, ab, params)
    assert out_b.shape == (big_b, 1)
    assert jnp.allclose(out_b, ref_b, atol=1e-4, rtol=1e-4)

    print("KERNEL_OK")
</pallas_src>

<mosaic_0001>
module attributes {stable_mosaic.version = 11 : i64} {
  func.func @qvalue_kernel(%arg0: i32, %arg1: memref<128x16xf32, #tpu.memory_space<vmem>>, %arg2: memref<128x8xf32, #tpu.memory_space<vmem>>, %arg3: memref<16x128xf32, #tpu.memory_space<vmem>>, %arg4: memref<8x128xf32, #tpu.memory_space<vmem>>, %arg5: memref<1x128xf32, #tpu.memory_space<vmem>>, %arg6: memref<1x128xf32, #tpu.memory_space<vmem>>, %arg7: memref<1x1xf32, #tpu.memory_space<smem>>, %arg8: memref<1x128xf32, #tpu.memory_space<vmem>>) attributes {dimension_semantics = [#tpu.dimension_semantics<parallel>], iteration_bounds = array<i64: 1>, scalar_prefetch = 0 : i64, scratch_operands = 0 : i64, tpu.core_type = #tpu.core_type<tc>, window_params = [{transform_indices = @transform_0, window_bounds = array<i64: 128, 16>}, {transform_indices = @transform_1, window_bounds = array<i64: 128, 8>}, {pipeline_mode = #tpu.pipeline_mode<synchronous>, transform_indices = @transform_2, window_bounds = array<i64: 16, 128>}, {pipeline_mode = #tpu.pipeline_mode<synchronous>, transform_indices = @transform_3, window_bounds = array<i64: 8, 128>}, {pipeline_mode = #tpu.pipeline_mode<synchronous>, transform_indices = @transform_4, window_bounds = array<i64: 1, 128>}, {pipeline_mode = #tpu.pipeline_mode<synchronous>, transform_indices = @transform_5, window_bounds = array<i64: 1, 128>}, {transform_indices = @transform_6, window_bounds = array<i64: 1, 1>}, {transform_indices = @transform_7, window_bounds = array<i64: 1, 128>}]} {
    %c0 = arith.constant 0 : index
    %c0_0 = arith.constant 0 : index
    %0 = vector.load %arg1[%c0, %c0_0] : memref<128x16xf32, #tpu.memory_space<vmem>>, vector<128x16xf32>
    %c0_1 = arith.constant 0 : index
    %c0_2 = arith.constant 0 : index
    %1 = vector.load %arg3[%c0_1, %c0_2] : memref<16x128xf32, #tpu.memory_space<vmem>>, vector<16x128xf32>
    %cst = arith.constant dense<0.000000e+00> : vector<128x128xf32>
    %2 = tpu.matmul %0, %1, %cst {dimension_numbers = #tpu.dot_dimension_numbers<[1], [0], [0], [1], [0, 0, 1, 1], [], []>} : vector<128x16xf32>, vector<16x128xf32>, vector<128x128xf32> -> vector<128x128xf32>
    %c0_3 = arith.constant 0 : index
    %c0_4 = arith.constant 0 : index
    %3 = vector.load %arg2[%c0_3, %c0_4] : memref<128x8xf32, #tpu.memory_space<vmem>>, vector<128x8xf32>
    %c0_5 = arith.constant 0 : index
    %c0_6 = arith.constant 0 : index
    %4 = vector.load %arg4[%c0_5, %c0_6] : memref<8x128xf32, #tpu.memory_space<vmem>>, vector<8x128xf32>
    %cst_7 = arith.constant dense<0.000000e+00> : vector<128x128xf32>
    %5 = tpu.matmul %3, %4, %cst_7 {dimension_numbers = #tpu.dot_dimension_numbers<[1], [0], [0], [1], [0, 0, 1, 1], [], []>} : vector<128x8xf32>, vector<8x128xf32>, vector<128x128xf32> -> vector<128x128xf32>
    %6 = arith.addf %2, %5 : vector<128x128xf32>
    %c0_8 = arith.constant 0 : index
    %c0_9 = arith.constant 0 : index
    %7 = vector.load %arg5[%c0_8, %c0_9] : memref<1x128xf32, #tpu.memory_space<vmem>>, vector<1x128xf32>
    %8 = vector.broadcast %7 : vector<1x128xf32> to vector<128x128xf32>
    %9 = arith.addf %6, %8 : vector<128x128xf32>
    %cst_10 = arith.constant 0.000000e+00 : f32
    %10 = vector.broadcast %cst_10 : f32 to vector<128x128xf32>
    %11 = arith.maximumf %9, %10 : vector<128x128xf32>
    %c0_11 = arith.constant 0 : index
    %c0_12 = arith.constant 0 : index
    %12 = vector.load %arg6[%c0_11, %c0_12] : memref<1x128xf32, #tpu.memory_space<vmem>>, vector<1x128xf32>
    %cst_13 = arith.constant dense<0.000000e+00> : vector<1x128xf32>
    %13 = tpu.matmul %12, %11, %cst_13 {dimension_numbers = #tpu.dot_dimension_numbers<[1], [1], [0], [0], [0, 0, 1, 0], [], []>} : vector<1x128xf32>, vector<128x128xf32>, vector<1x128xf32> -> vector<1x128xf32>
    %c0_14 = arith.constant 0 : index
    %c0_15 = arith.constant 0 : index
    %14 = memref.load %arg7[%c0_14, %c0_15] : memref<1x1xf32, #tpu.memory_space<smem>>
    %15 = vector.broadcast %14 : f32 to vector<1x128xf32>
    %16 = arith.addf %13, %15 : vector<1x128xf32>
    %c0_16 = arith.constant 0 : index
    %c0_17 = arith.constant 0 : index
    %17 = vector.load %arg8[%c0_16, %c0_17] : memref<1x128xf32, #tpu.memory_space<vmem>>, vector<1x128xf32>
    tpu.vector_store %arg8[%c0_16, %c0_17], %16 {strides = array<i32>} : memref<1x128xf32, #tpu.memory_space<vmem>>, vector<1x128xf32>,
    return
  }
  func.func @transform_0(%arg0: i32) -> (i32, i32) {
    %c0_i32 = arith.constant 0 : i32
    %c0_i32_0 = arith.constant 0 : i32
    return %arg0, %c0_i32 : i32, i32
  }
  func.func @transform_1(%arg0: i32) -> (i32, i32) {
    %c0_i32 = arith.constant 0 : i32
    %c0_i32_0 = arith.constant 0 : i32
    return %arg0, %c0_i32 : i32, i32
  }
  func.func @transform_2(%arg0: i32) -> (i32, i32) {
    %c0_i32 = arith.constant 0 : i32
    %c0_i32_0 = arith.constant 0 : i32
    %c0_i32_1 = arith.constant 0 : i32
    return %c0_i32, %c0_i32_0 : i32, i32
  }
  func.func @transform_3(%arg0: i32) -> (i32, i32) {
    %c0_i32 = arith.constant 0 : i32
    %c0_i32_0 = arith.constant 0 : i32
    %c0_i32_1 = arith.constant 0 : i32
    return %c0_i32, %c0_i32_0 : i32, i32
  }
  func.func @transform_4(%arg0: i32) -> (i32, i32) {
    %c0_i32 = arith.constant 0 : i32
    %c0_i32_0 = arith.constant 0 : i32
    %c0_i32_1 = arith.constant 0 : i32
    return %c0_i32, %c0_i32_0 : i32, i32
  }
  func.func @transform_5(%arg0: i32) -> (i32, i32) {
    %c0_i32 = arith.constant 0 : i32
    %c0_i32_0 = arith.constant 0 : i32
    %c0_i32_1 = arith.constant 0 : i32
    return %c0_i32, %c0_i32_0 : i32, i32
  }
  func.func @transform_6(%arg0: i32) -> (i32, i32) {
    %c0_i32 = arith.constant 0 : i32
    %c0_i32_0 = arith.constant 0 : i32
    %c0_i32_1 = arith.constant 0 : i32
    return %c0_i32, %c0_i32_0 : i32, i32
  }
  func.func @transform_7(%arg0: i32) -> (i32, i32) {
    %c0_i32 = arith.constant 0 : i32
    %c0_i32_0 = arith.constant 0 : i32
    return %c0_i32, %arg0 : i32, i32
  }
}

</mosaic_0001>

<bundles_post_ra>
// kernel: qvalue_forward.1
= control target key start
LH: loop header
LB: loop body
LE: loop exit
PB: predicated region body
PF: predicated region fallthrough
CT: control target
= control target key end

     0   :  { %13 = vsyncpa [#allocation4], 0  ;;  %s1085_s0 = inlined_call_operand.vmem [shape: f32[2,16], index: 0, kind: input, shape index: {}]   ;;  %s1086_s1 = inlined_call_operand.vmem [shape: f32[2,8], index: 1, kind: input, shape index: {}]   ;;  %s1087_s2 = inlined_call_operand.hbm [shape: f32[16,128], index: 2, kind: input, shape index: {}]   ;;  %s1088_s3 = inlined_call_operand.vmem [shape: f32[8,128], index: 3, kind: input, shape index: {}]   ;;  %s1089_s4 = inlined_call_operand.vmem [shape: f32[1,128], index: 4, kind: input, shape index: {}]   ;;  %s1090_s5 = inlined_call_operand.vmem [shape: f32[1,128], index: 5, kind: input, shape index: {}]   ;;  %s1091_s6 = inlined_call_operand.<no memory space> [shape: f32[1,1], index: 6, kind: input, shape index: {}]   ;;  %s1092_s7 = inlined_call_operand.hbm [shape: f32[1,2], index: 7, kind: output, shape index: {}]  }
   0x1   :  { %14 = vsyncpa [#allocation5], 0  ;;  %s866_s24 = smov [#allocation3]   ;;  %s818_s28 = scalar_lea.hbm %s1087_s2, 256 }
   0x2   :  { %s24_s25 = sshll.u32 %s866_s24, 4  ;;  %p819_p0 = scmp.ne.s32.totalorder %s1087_s2, %s818_s28  ;;  %s25_s25 = int_to_ptr.vmem [resolvable:$true] %s24_s25 }
   0x3   :  { %p822_p1 = scmp.lt.u32.totalorder %s818_s28, %s1087_s2 }
   0x5   :  { %p824_p2 = pnand %p822_p1, %p819_p0 }
   0x7   :  { %827 = shalt.err (!%p824_p2)
}
   0x8   :  { %s828_s10 = scalar_lea.vmem %s25_s25, 256  ;;  %p833_p4 = scmp.lt.s32.totalorder %s25_s25, %s25_s25 }
   0x9   :  { %p829_p3 = scmp.ne.s32.totalorder %s25_s25, %s828_s10  ;;  %p834_p5 = scmp.lt.s32.totalorder %s828_s10, %s828_s10 }
   0xb   :  { %p835_p6 = por %p834_p5, %p833_p4 }
   0xd   :  { %p836_p7 = pnand %p835_p6, %p829_p3 }
   0xf   :  { %839 = shalt.err (!%p836_p7)
}
  0x10   :  { %s867_s11 = smov 128   ;;  %s868_s12 = smov 8  }
  0x11   :  { %30 = dma.hbm_to_vmem [thread:$0]  %s1087_s2, 256, %s25_s25, [#allocation4], %s867_s11, %s867_s11, %s868_s12  }
  0x12   :  { %862 = dma.done.wait [#allocation4], 256  }
  0x13   :  { %863 = vsyncadd [#allocation4], 4294967040  ;;  %vm77_vm0 = vcmask 64512   ;;  %v76_v0 = vld [vmem:[%s1088_s3] sm:$0xff]  ;;  %v61_v2 = vld [vmem:[%s1086_s1 + $0x8] sm:$0xff]  ;;  %vm271_vm1 = vcmask 130048  }
  0x14   :  { %v60_v1 = vld [vmem:[%s1086_s1] sm:$0xff]  ;;  %678 = vmatprep.subr.mxu0 %v76_v0  ;;  %v59_v4 = vld [vmem:[#allocation3 + $0x8] sm:$0xff]  ;;  %v62_v5 = vld [vmem:[%s1086_s1 + $0x10] sm:$0xff]  ;;  %v869_v36 = vmov 0.0|0.0   ;;  %vm870_vm2 = vmmov 0   ;;  %v871_v37 = vmov 0.0  }
  0x15   :  { %680 = vmatprep.mubr.msk.f32.mxu0 %vm77_vm0, %v60_v1  ;;  %v58_v3 = vld [vmem:[#allocation3] sm:$0xff]  ;;  %679 = vmatpush3.msra.mxu0 %v76_v0  ;;  %v63_v7 = vld [vmem:[%s1086_s1 + $0x18] sm:$0xff]  ;;  %v65_v9 = vld [vmem:[%s1086_s1 + $0x28] sm:$0xff]  ;;  %s872_s8 = smov [#allocation6]  }
  0x16   :  { %v767_v6 = vpack.c.bf16 %v59_v4, %v58_v3  ;;  %681 = vmatmul.mubr.msk.f32.vlgmr.msra.gmra.mrb[0].mxu0 %vm77_vm0, %v61_v2  ;;  %v64_v8 = vld [vmem:[%s1086_s1 + $0x20] sm:$0xff]  ;;  %v66_v10 = vld [vmem:[%s1086_s1 + $0x30] sm:$0xff]  ;;  %v67_v11 = vld [vmem:[%s1086_s1 + $0x38] sm:$0xff]  ;;  %771 = vmatprep.subr.bf16.mxu1 %v869_v36  ;;  %s584_s9 = sshll.u32 %s872_s8, 4  ;;  %s585_s9 = int_to_ptr.vmem [resolvable:$true] %s584_s9 }
  0x17   :  { %683 = vmatprep.mubr.msk.f32.mxu0 %vm77_vm0, %v62_v5  ;;  %v68_v12 = vld [vmem:[%s1086_s1 + $0x40] sm:$0xff]  ;;  %v69_v13 = vld [vmem:[%s1086_s1 + $0x48] sm:$0xff]  ;;  %v70_v14 = vld [vmem:[%s1086_s1 + $0x50] sm:$0xff]  ;;  %764 = vmatprep.mubr.msk.f32.mxu1 %vm870_vm2, %v871_v37  ;;  %s840_s10 = scalar_lea.vmem %s585_s9, 16  ;;  %s844_s11 = scalar_lea.vmem %s585_s9, 32 }
  0x18   :  { %768 = vmatprep.subr.bf16.mxu0 %v767_v6  ;;  %v71_v15 = vld [vmem:[%s1086_s1 + $0x58] sm:$0xff]  ;;  %v72_v16 = vld [vmem:[%s1086_s1 + $0x60] sm:$0xff]  ;;  %v73_v17 = vld [vmem:[%s1086_s1 + $0x68] sm:$0xff]  ;;  %p841_p8 = scmp.ne.s32.totalorder %s585_s9, %s840_s10  ;;  %p845_p9 = scmp.lt.s32.totalorder %s585_s9, %s585_s9 }
  0x19   :  { %770 = vmatpush3.bf16.msra.mxu0 %v767_v6  ;;  %v74_v18 = vld [vmem:[%s1086_s1 + $0x70] sm:$0xff]  ;;  %v75_v19 = vld [vmem:[%s1086_s1 + $0x78] sm:$0xff]  ;;  %v42_v20 = vld [vmem:[%s1085_s0] sm:$0xff]  ;;  %p846_p10 = scmp.lt.s32.totalorder %s844_s11, %s840_s10 }
  0x1a   :  { %684 = vmatmul.mubr.msk.f32.gmra.mrb[2].mxu0 %vm77_vm0, %v63_v7  ;;  %v43_v21 = vld [vmem:[%s1085_s0 + $0x8] sm:$0xff]  ;;  %v44_v22 = vld [vmem:[%s1085_s0 + $0x10] sm:$0xff]  ;;  %v45_v23 = vld [vmem:[%s1085_s0 + $0x18] sm:$0xff] }
  0x1b   :  { %686 = vmatprep.mubr.msk.f32.mxu0 %vm77_vm0, %v64_v8  ;;  %v46_v24 = vld [vmem:[%s1085_s0 + $0x20] sm:$0xff]  ;;  %v47_v25 = vld [vmem:[%s1085_s0 + $0x28] sm:$0xff]  ;;  %v48_v26 = vld [vmem:[%s1085_s0 + $0x30] sm:$0xff]  ;;  %p847_p11 = por %p846_p10, %p845_p9 }
  0x1c   :  { %v49_v27 = vld [vmem:[%s1085_s0 + $0x38] sm:$0xff]  ;;  %v50_v28 = vld [vmem:[%s1085_s0 + $0x40] sm:$0xff]  ;;  %v51_v29 = vld [vmem:[%s1085_s0 + $0x48] sm:$0xff] }
  0x1d   :  { %v52_v30 = vld [vmem:[%s1085_s0 + $0x50] sm:$0xff]  ;;  %v53_v31 = vld [vmem:[%s1085_s0 + $0x58] sm:$0xff]  ;;  %v54_v32 = vld [vmem:[%s1085_s0 + $0x60] sm:$0xff]  ;;  %p848_p12 = pnand %p847_p11, %p841_p8 }
  0x1e   :  { %687 = vmatmul.mubr.msk.f32.gmra.mrb[4].mxu0 %vm77_vm0, %v65_v9  ;;  %v55_v33 = vld [vmem:[%s1085_s0 + $0x68] sm:$0xff]  ;;  %v56_v34 = vld [vmem:[%s1085_s0 + $0x70] sm:$0xff]  ;;  %v57_v35 = vld [vmem:[%s1085_s0 + $0x78] sm:$0xff] }
  0x1f   :  { %689 = vmatprep.mubr.msk.f32.mxu0 %vm77_vm0, %v66_v10  ;;  %v625_v38 = vld [vmem:[%s1089_s4] ss:$0 sm:$0xff] }
  0x22   :  { %690 = vmatmul.mubr.msk.f32.gmra.mrb[6].mxu0 %vm77_vm0, %v67_v11 }
  0x23   :  { %692 = vmatprep.mubr.msk.f32.mxu0 %vm77_vm0, %v68_v12 }
  0x26   :  { %693 = vmatmul.mubr.msk.f32.gmra.mrb[8].mxu0 %vm77_vm0, %v69_v13 }
  0x27   :  { %695 = vmatprep.mubr.msk.f32.mxu0 %vm77_vm0, %v70_v14 }
  0x2a   :  { %696 = vmatmul.mubr.msk.f32.gmra.mrb[10].mxu0 %vm77_vm0, %v71_v15 }
  0x2b   :  { %698 = vmatprep.mubr.msk.f32.mxu0 %vm77_vm0, %v72_v16 }
  0x2e   :  { %699 = vmatmul.mubr.msk.f32.gmra.mrb[12].mxu0 %vm77_vm0, %v73_v17 }
  0x2f   :  { %701 = vmatprep.mubr.msk.f32.mxu0 %vm77_vm0, %v74_v18 }
  0x32   :  { %702 = vmatmul.mubr.msk.f32.gmra.mrb[14].mxu0 %vm77_vm0, %v75_v19 }
  0x33   :  { %708 = vmatprep.mubr.msk.f32.mxu0 %vm271_vm1, %v42_v20 }
  0x36   :  { %709 = vmatmul.mubr.msk.f32.vlgmr.msra.gmra.mrb[0].mxu0 %vm271_vm1, %v43_v21 }
  0x37   :  { %711 = vmatprep.mubr.msk.f32.mxu0 %vm271_vm1, %v44_v22 }
  0x3a   :  { %712 = vmatmul.mubr.msk.f32.gmra.mrb[2].mxu0 %vm271_vm1, %v45_v23 }
  0x3b   :  { %714 = vmatprep.mubr.msk.f32.mxu0 %vm271_vm1, %v46_v24 }
  0x3e   :  { %715 = vmatmul.mubr.msk.f32.gmra.mrb[4].mxu0 %vm271_vm1, %v47_v25 }
  0x3f   :  { %717 = vmatprep.mubr.msk.f32.mxu0 %vm271_vm1, %v48_v26 }
  0x42   :  { %718 = vmatmul.mubr.msk.f32.gmra.mrb[6].mxu0 %vm271_vm1, %v49_v27 }
  0x43   :  { %720 = vmatprep.mubr.msk.f32.mxu0 %vm271_vm1, %v50_v28 }
  0x46   :  { %721 = vmatmul.mubr.msk.f32.gmra.mrb[8].mxu0 %vm271_vm1, %v51_v29 }
  0x47   :  { %723 = vmatprep.mubr.msk.f32.mxu0 %vm271_vm1, %v52_v30 }
  0x4a   :  { %724 = vmatmul.mubr.msk.f32.gmra.mrb[10].mxu0 %vm271_vm1, %v53_v31  ;;  %v504_v31 = vld [vmem:[%s1090_s5] sm:$0x1] }
  0x4b   :  { %726 = vmatprep.mubr.msk.f32.mxu0 %vm271_vm1, %v54_v32  ;;  %v506_v32 = vstv %s1091_s6 }
  0x4e   :  { %727 = vmatmul.mubr.msk.f32.gmra.mrb[12].mxu0 %vm271_vm1, %v55_v33 }
  0x4f   :  { %729 = vmatprep.mubr.msk.f32.mxu0 %vm271_vm1, %v56_v34 }
  0x52   :  { %730 = vmatmul.mubr.msk.f32.gmra.mrb[14].mxu0 %vm271_vm1, %v57_v35 }
 0x109   :  { %v710_v39 = vpop.f32.mrb[0].mxu0 }
 0x10a   :  { %v473_v40 = vadd.f32 %v710_v39, %v625_v38  ;;  %v386_v41 = vpop.f32.mrb[1].mxu0 }
 0x10b   :  { %v472_v42 = vadd.f32 %v625_v38, %v386_v41 }
 0x10c   :  { %v489_v43 = vmax.f32 %v473_v40, 0.0 }
 0x10d   :  { %v488_v44 = vmax.f32 %v472_v42, 0.0  ;;  %v713_v45 = vpop.f32.mrb[2].mxu0 }
 0x10e   :  { %v475_v46 = vadd.f32 %v713_v45, %v625_v38  ;;  %v396_v47 = vpop.f32.mrb[3].mxu0 }
 0x10f   :  { %v474_v48 = vadd.f32 %v625_v38, %v396_v47  ;;  %v772_v49 = vpack.c.bf16 %v489_v43, %v488_v44 }
 0x110   :  { %v491_v50 = vmax.f32 %v475_v46, 0.0 }
 0x111   :  { %v490_v51 = vmax.f32 %v474_v48, 0.0  ;;  %v716_v52 = vpop.f32.mrb[4].mxu0  ;;  %773 = vmatpush3.bf16.xpose.msra.mxu1 %v772_v49 }
 0x112   :  { %v477_v53 = vadd.f32 %v716_v52, %v625_v38  ;;  %v406_v54 = vpop.f32.mrb[5].mxu0  ;;  %774 = vmatprep.subr.bf16.mxu1 %v869_v36 }
 0x113   :  { %v775_v55 = vpack.c.bf16 %v491_v50, %v490_v51  ;;  %v476_v56 = vadd.f32 %v625_v38, %v406_v54 }
 0x114   :  { %v493_v57 = vmax.f32 %v477_v53, 0.0 }
 0x115   :  { %v492_v58 = vmax.f32 %v476_v56, 0.0  ;;  %v719_v59 = vpop.f32.mrb[6].mxu0 }
 0x116   :  { %v479_v60 = vadd.f32 %v719_v59, %v625_v38  ;;  %v416_v61 = vpop.f32.mrb[7].mxu0 }
 0x117   :  { %v778_v62 = vpack.c.bf16 %v493_v57, %v492_v58  ;;  %v478_v63 = vadd.f32 %v625_v38, %v416_v61 }
 0x118   :  { %v495_v0 = vmax.f32 %v479_v60, 0.0 }
 0x119   :  { %v494_v1 = vmax.f32 %v478_v63, 0.0  ;;  %v722_v2 = vpop.f32.mrb[8].mxu0  ;;  %776 = vmatpush3.bf16.xpose.msra.mxu1 %v775_v55 }
 0x11a   :  { %v481_v3 = vadd.f32 %v722_v2, %v625_v38  ;;  %v426_v4 = vpop.f32.mrb[9].mxu0  ;;  %777 = vmatprep.subr.bf16.mxu1 %v869_v36 }
 0x11b   :  { %v781_v5 = vpack.c.bf16 %v495_v0, %v494_v1  ;;  %v480_v6 = vadd.f32 %v625_v38, %v426_v4 }
 0x11c   :  { %v497_v7 = vmax.f32 %v481_v3, 0.0 }
 0x11d   :  { %v496_v8 = vmax.f32 %v480_v6, 0.0  ;;  %v725_v9 = vpop.f32.mrb[10].mxu0 }
 0x11e   :  { %v483_v10 = vadd.f32 %v725_v9, %v625_v38  ;;  %v436_v11 = vpop.f32.mrb[11].mxu0 }
 0x11f   :  { %v784_v12 = vpack.c.bf16 %v497_v7, %v496_v8  ;;  %v482_v13 = vadd.f32 %v625_v38, %v436_v11 }
 0x120   :  { %v499_v14 = vmax.f32 %v483_v10, 0.0 }
 0x121   :  { %v498_v15 = vmax.f32 %v482_v13, 0.0  ;;  %v728_v16 = vpop.f32.mrb[12].mxu0  ;;  %779 = vmatpush3.bf16.xpose.msra.mxu1 %v778_v62 }
 0x122   :  { %v485_v17 = vadd.f32 %v728_v16, %v625_v38  ;;  %v446_v18 = vpop.f32.mrb[13].mxu0  ;;  %780 = vmatprep.subr.bf16.mxu1 %v869_v36 }
 0x123   :  { %v787_v19 = vpack.c.bf16 %v499_v14, %v498_v15  ;;  %v484_v20 = vadd.f32 %v625_v38, %v446_v18 }
 0x124   :  { %v501_v21 = vmax.f32 %v485_v17, 0.0 }
 0x125   :  { %v500_v22 = vmax.f32 %v484_v20, 0.0  ;;  %v731_v23 = vpop.f32.mrb[14].mxu0 }
 0x126   :  { %v487_v24 = vadd.f32 %v731_v23, %v625_v38  ;;  %v456_v25 = vpop.f32.mrb[15].mxu0 }
 0x127   :  { %v790_v26 = vpack.c.bf16 %v501_v21, %v500_v22  ;;  %v486_v27 = vadd.f32 %v625_v38, %v456_v25 }
 0x128   :  { %v503_v28 = vmax.f32 %v487_v24, 0.0 }
 0x129   :  { %v502_v29 = vmax.f32 %v486_v27, 0.0  ;;  %782 = vmatpush3.bf16.xpose.msra.mxu1 %v781_v5 }
 0x12a   :  { %783 = vmatprep.subr.bf16.mxu1 %v869_v36 }
 0x12b   :  { %v793_v30 = vpack.c.bf16 %v503_v28, %v502_v29 }
 0x131   :  { %785 = vmatpush3.bf16.xpose.msra.mxu1 %v784_v12 }
 0x132   :  { %786 = vmatprep.subr.bf16.mxu1 %v869_v36 }
 0x139   :  { %788 = vmatpush3.bf16.xpose.msra.mxu1 %v787_v19 }
 0x13a   :  { %789 = vmatprep.subr.bf16.mxu1 %v869_v36 }
 0x141   :  { %791 = vmatpush3.bf16.xpose.msra.mxu1 %v790_v26 }
 0x142   :  { %792 = vmatprep.subr.bf16.mxu1 %v869_v36 }
 0x149   :  { %794 = vmatpush3.bf16.xpose.msra.mxu1 %v793_v30 }
 0x150   :  { %765 = vmatmul.mubr.f32.vlgmr.msra.gmra.mrb[0].mxu1 %v504_v31 }
 0x223   :  { %v573_v33 = vpop.f32.mrb[0].mxu1 }
 0x224   :  { %v574_v34 = vadd.f32 %v573_v33, %v506_v32  ;;  %v766_v35 = vpop.f32.mrb[1].mxu1 }
 0x226   :  { %577 = vst [vmem:[#allocation6] sm:$0x1] %v574_v34 }
 0x227   :  { %851 = shalt.err (!%p848_p12)
}
 0x228   :  { %s852_s13 = scalar_lea.hbm %s1092_s7, 16 }
 0x229   :  { %p853_p13 = scmp.ne.s32.totalorder %s1092_s7, %s852_s13  ;;  %p856_p0 = scmp.lt.u32.totalorder %s852_s13, %s1092_s7 }
 0x22b   :  { %p858_p1 = pnand %p856_p0, %p853_p13 }
 0x22d   :  { %861 = shalt.err (!%p858_p1)
}
 0x22e   :  { %587 = dma.vmem_to_hbm [thread:$0]  %s585_s9, 16, %s1092_s7, [#allocation5]  }
 0x22f   :  { %864 = dma.done.wait [#allocation5], 16  }
 0x230   :  { %865 = vsyncadd [#allocation5], 4294967280 }
 0x231   :  { %591 = vsyncpa [#allocation4], 1 }
 0x232   :  { %592 = vsyncpa [#allocation5], 1 }

</bundles_post_ra>
